<compile_context>
chip_gen: v5e
topology: v5e:2x2
jax: 0.10.0
libtpu: 0.0.40
codegen_flags: <defaults>
</compile_context>

<pallas_src>
import jax
import jax.numpy as jnp
from jax.experimental import pallas as pl
from jax.experimental.pallas import tpu as pltpu


def _softplus(x):
    # PyTorch nn.Softplus(beta=1, threshold=20)
    return jnp.where(x > 20.0, x, jnp.log1p(jnp.exp(jnp.minimum(x, 20.0))))


def _make_mlp_kernel(layer_dims, node_out):
    """Kernel refs: x (B, node_in), w_slab (L, max_in, max_out),
    v_slab (2*H+1, max_out), y_out (B, out_total)."""
    n_hidden = len(layer_dims) - 1

    def kernel(x_ref, w_ref, v_ref, y_ref):
        h = x_ref[...].astype(jnp.float32)
        # Hidden layers: Linear (bias cancelled by BN) -> BN -> Softplus.
        # Python-unrolled: widths differ per layer; keep static.
        for li in range(n_hidden):
            fi, fo = layer_dims[li]
            w = w_ref[li, :fi, :fo]
            g = v_ref[2 * li:2 * li + 1, :fo]
            be = v_ref[2 * li + 1:2 * li + 2, :fo]
            h = jnp.dot(h, w, preferred_element_type=jnp.float32)
            # BatchNorm1d, training-mode biased batch stats, eps=1e-5,
            # fused into one rsqrt + one scale/shift (single-pass variance).
            mean = jnp.mean(h, axis=0, keepdims=True)
            var = jnp.mean(h * h, axis=0, keepdims=True) - mean * mean
            var = jnp.maximum(var, 0.0)                      # fp-cancellation guard
            inv = jax.lax.rsqrt(var + 1e-5)
            scale = g * inv
            shift = be - mean * scale
            h = _softplus(h * scale + shift)
        # Final layer: Linear + bias, no BN; Softplus only on the
        # cholesky-diagonal columns [node_out, 2*node_out).
        fi, fo = layer_dims[-1]
        w = w_ref[n_hidden, :fi, :fo]
        b = v_ref[2 * n_hidden:2 * n_hidden + 1, :fo]
        y = jnp.dot(h, w, preferred_element_type=jnp.float32) + b
        col = jax.lax.broadcasted_iota(jnp.int32, y.shape, 1)
        diag_mask = (col >= node_out) & (col < 2 * node_out)
        y_ref[...] = jnp.where(diag_mask, _softplus(y), y)

    return kernel


def _assemble_heads(y, node_out, multi_noise):
    """Head glue (pure reshuffling, no hot-path compute)."""
    batch = y.shape[0]
    params = y[:, :node_out].reshape(-1, node_out, 1)
    diag = y[:, node_out:2 * node_out]           # Softplus already applied
    offdiag = y[:, 2 * node_out:]

    d = node_out
    chol = jnp.zeros((batch, d, d), y.dtype)
    di = jnp.arange(d)
    chol = chol.at[:, di, di].set(diag)                       # diag_embed
    iu0, iu1 = jnp.triu_indices(d, k=1)                       # row-major, matches torch
    chol = chol.at[:, iu0, iu1].set(offdiag)

    if multi_noise > 1:
        chunks = jnp.split(chol, multi_noise, axis=0)
        acc = chunks[0]
        for c in chunks[1:]:
            acc = acc + c
        chol = acc / jnp.sqrt(jnp.float32(multi_noise))
        chol = jnp.tile(chol, (multi_noise, 1, 1))

    return params, chol


def mlp_mvg_forward(x, hidden_params, final_params, node_out, multi_noise=1):
    """hidden_params: list of (W, b, gamma, beta); final_params: (W, b).

    W is (in_features, out_features) (transposed vs PyTorch) so the kernel
    computes h @ W on the MXU.  Hidden-layer biases are accepted for API
    compatibility but not sent to the kernel: BN re-centering cancels them.
    """
    n_hidden = len(hidden_params)
    batch = x.shape[0]
    out_total = final_params[0].shape[1]

    layer_dims = [(w.shape[0], w.shape[1]) for (w, _, _, _) in hidden_params]
    layer_dims.append((final_params[0].shape[0], final_params[0].shape[1]))
    max_in = max(fi for fi, _ in layer_dims)
    max_out = max(fo for _, fo in layer_dims)

    # --- operand packing: ~15 tiny arrays -> 3 kernel operands --------------
    w_slab = jnp.zeros((n_hidden + 1, max_in, max_out), jnp.float32)
    for li, (w, _, _, _) in enumerate(hidden_params):
        w_slab = w_slab.at[li, :w.shape[0], :w.shape[1]].set(w)
    wf, bf = final_params
    w_slab = w_slab.at[n_hidden, :wf.shape[0], :wf.shape[1]].set(wf)

    v_slab = jnp.zeros((2 * n_hidden + 1, max_out), jnp.float32)
    for li, (_, _, g, be) in enumerate(hidden_params):
        v_slab = v_slab.at[2 * li, :g.shape[1]].set(g[0])
        v_slab = v_slab.at[2 * li + 1, :be.shape[1]].set(be[0])
    v_slab = v_slab.at[2 * n_hidden, :bf.shape[1]].set(bf[0])

    # --- advisory cost estimate (tiny kernel) --------------------------------
    mm_flops = sum(2 * batch * fi * fo for fi, fo in layer_dims)
    hid_elems = sum(batch * fo for _, fo in layer_dims[:-1])
    flops = mm_flops + 10 * hid_elems
    transcendentals = hid_elems + batch * node_out + sum(fo for _, fo in layer_dims[:-1])
    bytes_accessed = 4 * (x.size + w_slab.size + v_slab.size + batch * out_total)

    y = pl.pallas_call(
        _make_mlp_kernel(layer_dims, node_out),
        out_shape=jax.ShapeDtypeStruct((batch, out_total), jnp.float32),
        in_specs=[pl.BlockSpec(memory_space=pltpu.MemorySpace.VMEM)] * 3,
        out_specs=pl.BlockSpec(memory_space=pltpu.MemorySpace.VMEM),
        compiler_params=pltpu.CompilerParams(vmem_limit_bytes=2 * 1024 * 1024),
        cost_estimate=pl.CostEstimate(
            flops=int(flops),
            transcendentals=int(transcendentals),
            bytes_accessed=int(bytes_accessed),
        ),
    )(x, w_slab, v_slab)

    return _assemble_heads(y, node_out, multi_noise)


def _reference_forward(x, hidden_params, final_params, node_out, multi_noise=1):
    """Pure-JAX reference with the ORIGINAL semantics (hidden bias kept,
    two-pass BN stats) — verifies the kernel's algebraic simplifications."""
    h = x.astype(jnp.float32)
    for (w, b, g, be) in hidden_params:
        h = h @ w + b
        mean = jnp.mean(h, axis=0, keepdims=True)
        var = jnp.mean((h - mean) ** 2, axis=0, keepdims=True)
        h = (h - mean) / jnp.sqrt(var + 1e-5) * g + be
        h = _softplus(h)
    wf, bf = final_params
    y = h @ wf + bf
    col = jnp.arange(y.shape[1])[None, :]
    diag_mask = (col >= node_out) & (col < 2 * node_out)
    y = jnp.where(diag_mask, _softplus(y), y)
    return _assemble_heads(y, node_out, multi_noise)


def init_params(nodes, key):
    """Deterministic PyTorch-Linear-style init: U(-1/sqrt(fan_in), 1/sqrt(fan_in))."""
    hidden = []
    keys = jax.random.split(key, len(nodes))
    for li in range(len(nodes) - 2):
        fan_in, fan_out = nodes[li], nodes[li + 1]
        bound = float(fan_in) ** -0.5
        kw, kb = jax.random.split(keys[li])
        w = jax.random.uniform(kw, (fan_in, fan_out), jnp.float32, -bound, bound)
        b = jax.random.uniform(kb, (1, fan_out), jnp.float32, -bound, bound)
        g = jnp.ones((1, fan_out), jnp.float32)    # BatchNorm1d weight
        be = jnp.zeros((1, fan_out), jnp.float32)  # BatchNorm1d bias
        hidden.append((w, b, g, be))
    fan_in, fan_out = nodes[-2], nodes[-1]
    bound = float(fan_in) ** -0.5
    kw, kb = jax.random.split(keys[-1])
    wf = jax.random.uniform(kw, (fan_in, fan_out), jnp.float32, -bound, bound)
    bf = jax.random.uniform(kb, (1, fan_out), jnp.float32, -bound, bound)
    return hidden, (wf, bf)


if __name__ == "__main__":
    node_in, node_out, hidden_layer = 32, 2, 3
    out_total = node_out * 2 + (node_out ** 2 - node_out) // 2   # = 5 for node_out=2
    # Decreasing hidden widths (stand-in for nodeframe.decreasingNode).
    nodes = [node_in, 24, 16, 8, out_total]
    batch = 8

    key = jax.random.PRNGKey(0)
    kx, kp = jax.random.split(key)
    x = jax.random.normal(kx, (batch, node_in), jnp.float32)
    hidden_params, final_params = init_params(nodes, kp)

    params, chol = mlp_mvg_forward(x, hidden_params, final_params, node_out,
                                   multi_noise=1)
    params, chol = jax.block_until_ready((params, chol))
    assert params.shape == (batch, node_out, 1)
    assert chol.shape == (batch, node_out, node_out)

    # Numerical check against a pure-JAX reference with the original semantics
    # (hidden bias + two-pass BN), validating the bias-folding / rsqrt rewrite.
    ref_params, ref_chol = _reference_forward(x, hidden_params, final_params,
                                              node_out, multi_noise=1)
    assert bool(jnp.allclose(params, ref_params, rtol=1e-3, atol=1e-3))
    assert bool(jnp.allclose(chol, ref_chol, rtol=1e-3, atol=1e-3))

    # Also exercise the multi_noise > 1 branch (glue path).
    params2, chol2 = mlp_mvg_forward(x, hidden_params, final_params, node_out,
                                     multi_noise=2)
    params2, chol2 = jax.block_until_ready((params2, chol2))
    assert chol2.shape == (batch, node_out, node_out)

    print("KERNEL_OK")
</pallas_src>

<mosaic_0001>
module attributes {stable_mosaic.version = 11 : i64} {
  func.func @kernel(%arg0: memref<8x32xf32, #tpu.memory_space<vmem>>, %arg1: memref<4x32x24xf32, #tpu.memory_space<vmem>>, %arg2: memref<7x24xf32, #tpu.memory_space<vmem>>, %arg3: memref<8x5xf32, #tpu.memory_space<vmem>>) attributes {dimension_semantics = [], scalar_prefetch = 0 : i64, scratch_operands = 0 : i64, tpu.core_type = #tpu.core_type<tc>} {
    %c0 = arith.constant 0 : index
    %c0_0 = arith.constant 0 : index
    %0 = vector.load %arg0[%c0, %c0_0] : memref<8x32xf32, #tpu.memory_space<vmem>>, vector<8x32xf32>
    %c0_1 = arith.constant 0 : index
    %c0_2 = arith.constant 0 : index
    %c0_3 = arith.constant 0 : index
    %1 = vector.load %arg1[%c0_1, %c0_2, %c0_3] : memref<4x32x24xf32, #tpu.memory_space<vmem>>, vector<1x32x24xf32>
    %2 = vector.shape_cast %1 : vector<1x32x24xf32> to vector<32x24xf32>
    %c0_4 = arith.constant 0 : index
    %c0_5 = arith.constant 0 : index
    %3 = vector.load %arg2[%c0_4, %c0_5] : memref<7x24xf32, #tpu.memory_space<vmem>>, vector<1x24xf32>
    %c1 = arith.constant 1 : index
    %c0_6 = arith.constant 0 : index
    %4 = vector.load %arg2[%c1, %c0_6] : memref<7x24xf32, #tpu.memory_space<vmem>>, vector<1x24xf32>
    %cst = arith.constant dense<0.000000e+00> : vector<8x24xf32>
    %5 = tpu.matmul %0, %2, %cst {dimension_numbers = #tpu.dot_dimension_numbers<[1], [0], [0], [1], [0, 0, 1, 1], [], []>} : vector<8x32xf32>, vector<32x24xf32>, vector<8x24xf32> -> vector<8x24xf32>
    %cst_7 = arith.constant dense<0.000000e+00> : vector<24xf32>
    %6 = vector.multi_reduction <add>, %5, %cst_7 [0] : vector<8x24xf32> to vector<24xf32>
    %7 = vector.shape_cast %6 : vector<24xf32> to vector<1x24xf32>
    %cst_8 = arith.constant 8.000000e+00 : f32
    %8 = vector.broadcast %cst_8 : f32 to vector<1x24xf32>
    %9 = arith.divf %7, %8 : vector<1x24xf32>
    %10 = arith.mulf %5, %5 : vector<8x24xf32>
    %cst_9 = arith.constant dense<0.000000e+00> : vector<24xf32>
    %11 = vector.multi_reduction <add>, %10, %cst_9 [0] : vector<8x24xf32> to vector<24xf32>
    %12 = vector.shape_cast %11 : vector<24xf32> to vector<1x24xf32>
    %cst_10 = arith.constant 8.000000e+00 : f32
    %13 = vector.broadcast %cst_10 : f32 to vector<1x24xf32>
    %14 = arith.divf %12, %13 : vector<1x24xf32>
    %15 = arith.mulf %9, %9 : vector<1x24xf32>
    %16 = arith.subf %14, %15 : vector<1x24xf32>
    %cst_11 = arith.constant 0.000000e+00 : f32
    %17 = vector.broadcast %cst_11 : f32 to vector<1x24xf32>
    %18 = arith.maximumf %16, %17 : vector<1x24xf32>
    %cst_12 = arith.constant 9.99999974E-6 : f32
    %19 = vector.broadcast %cst_12 : f32 to vector<1x24xf32>
    %20 = arith.addf %18, %19 : vector<1x24xf32>
    %21 = math.rsqrt %20 : vector<1x24xf32>
    %22 = arith.mulf %3, %21 : vector<1x24xf32>
    %23 = arith.mulf %9, %22 : vector<1x24xf32>
    %24 = arith.subf %4, %23 : vector<1x24xf32>
    %25 = vector.broadcast %22 : vector<1x24xf32> to vector<8x24xf32>
    %26 = arith.mulf %5, %25 : vector<8x24xf32>
    %27 = vector.broadcast %24 : vector<1x24xf32> to vector<8x24xf32>
    %28 = arith.addf %26, %27 : vector<8x24xf32>
    %cst_13 = arith.constant 2.000000e+01 : f32
    %29 = vector.broadcast %cst_13 : f32 to vector<8x24xf32>
    %30 = arith.cmpf ogt, %28, %29 : vector<8x24xf32>
    %cst_14 = arith.constant 2.000000e+01 : f32
    %31 = vector.broadcast %cst_14 : f32 to vector<8x24xf32>
    %32 = arith.minimumf %28, %31 : vector<8x24xf32>
    %33 = math.exp %32 : vector<8x24xf32>
    %34 = math.log1p %33 : vector<8x24xf32>
    %35 = arith.select %30, %28, %34 : vector<8x24xi1>, vector<8x24xf32>
    %c1_15 = arith.constant 1 : index
    %c0_16 = arith.constant 0 : index
    %c0_17 = arith.constant 0 : index
    %36 = vector.load %arg1[%c1_15, %c0_16, %c0_17] : memref<4x32x24xf32, #tpu.memory_space<vmem>>, vector<1x24x16xf32>
    %37 = vector.shape_cast %36 : vector<1x24x16xf32> to vector<24x16xf32>
    %c2 = arith.constant 2 : index
    %c0_18 = arith.constant 0 : index
    %38 = vector.load %arg2[%c2, %c0_18] : memref<7x24xf32, #tpu.memory_space<vmem>>, vector<1x16xf32>
    %c3 = arith.constant 3 : index
    %c0_19 = arith.constant 0 : index
    %39 = vector.load %arg2[%c3, %c0_19] : memref<7x24xf32, #tpu.memory_space<vmem>>, vector<1x16xf32>
    %cst_20 = arith.constant dense<0.000000e+00> : vector<8x16xf32>
    %40 = tpu.matmul %35, %37, %cst_20 {dimension_numbers = #tpu.dot_dimension_numbers<[1], [0], [0], [1], [0, 0, 1, 1], [], []>} : vector<8x24xf32>, vector<24x16xf32>, vector<8x16xf32> -> vector<8x16xf32>
    %cst_21 = arith.constant dense<0.000000e+00> : vector<16xf32>
    %41 = vector.multi_reduction <add>, %40, %cst_21 [0] : vector<8x16xf32> to vector<16xf32>
    %42 = vector.shape_cast %41 : vector<16xf32> to vector<1x16xf32>
    %cst_22 = arith.constant 8.000000e+00 : f32
    %43 = vector.broadcast %cst_22 : f32 to vector<1x16xf32>
    %44 = arith.divf %42, %43 : vector<1x16xf32>
    %45 = arith.mulf %40, %40 : vector<8x16xf32>
    %cst_23 = arith.constant dense<0.000000e+00> : vector<16xf32>
    %46 = vector.multi_reduction <add>, %45, %cst_23 [0] : vector<8x16xf32> to vector<16xf32>
    %47 = vector.shape_cast %46 : vector<16xf32> to vector<1x16xf32>
    %cst_24 = arith.constant 8.000000e+00 : f32
    %48 = vector.broadcast %cst_24 : f32 to vector<1x16xf32>
    %49 = arith.divf %47, %48 : vector<1x16xf32>
    %50 = arith.mulf %44, %44 : vector<1x16xf32>
    %51 = arith.subf %49, %50 : vector<1x16xf32>
    %cst_25 = arith.constant 0.000000e+00 : f32
    %52 = vector.broadcast %cst_25 : f32 to vector<1x16xf32>
    %53 = arith.maximumf %51, %52 : vector<1x16xf32>
    %cst_26 = arith.constant 9.99999974E-6 : f32
    %54 = vector.broadcast %cst_26 : f32 to vector<1x16xf32>
    %55 = arith.addf %53, %54 : vector<1x16xf32>
    %56 = math.rsqrt %55 : vector<1x16xf32>
    %57 = arith.mulf %38, %56 : vector<1x16xf32>
    %58 = arith.mulf %44, %57 : vector<1x16xf32>
    %59 = arith.subf %39, %58 : vector<1x16xf32>
    %60 = vector.broadcast %57 : vector<1x16xf32> to vector<8x16xf32>
    %61 = arith.mulf %40, %60 : vector<8x16xf32>
    %62 = vector.broadcast %59 : vector<1x16xf32> to vector<8x16xf32>
    %63 = arith.addf %61, %62 : vector<8x16xf32>
    %cst_27 = arith.constant 2.000000e+01 : f32
    %64 = vector.broadcast %cst_27 : f32 to vector<8x16xf32>
    %65 = arith.cmpf ogt, %63, %64 : vector<8x16xf32>
    %cst_28 = arith.constant 2.000000e+01 : f32
    %66 = vector.broadcast %cst_28 : f32 to vector<8x16xf32>
    %67 = arith.minimumf %63, %66 : vector<8x16xf32>
    %68 = math.exp %67 : vector<8x16xf32>
    %69 = math.log1p %68 : vector<8x16xf32>
    %70 = arith.select %65, %63, %69 : vector<8x16xi1>, vector<8x16xf32>
    %c2_29 = arith.constant 2 : index
    %c0_30 = arith.constant 0 : index
    %c0_31 = arith.constant 0 : index
    %71 = vector.load %arg1[%c2_29, %c0_30, %c0_31] : memref<4x32x24xf32, #tpu.memory_space<vmem>>, vector<1x16x8xf32>
    %72 = vector.shape_cast %71 : vector<1x16x8xf32> to vector<16x8xf32>
    %c4 = arith.constant 4 : index
    %c0_32 = arith.constant 0 : index
    %73 = vector.load %arg2[%c4, %c0_32] : memref<7x24xf32, #tpu.memory_space<vmem>>, vector<1x8xf32>
    %c5 = arith.constant 5 : index
    %c0_33 = arith.constant 0 : index
    %74 = vector.load %arg2[%c5, %c0_33] : memref<7x24xf32, #tpu.memory_space<vmem>>, vector<1x8xf32>
    %cst_34 = arith.constant dense<0.000000e+00> : vector<8x8xf32>
    %75 = tpu.matmul %70, %72, %cst_34 {dimension_numbers = #tpu.dot_dimension_numbers<[1], [0], [0], [1], [0, 0, 1, 1], [], []>} : vector<8x16xf32>, vector<16x8xf32>, vector<8x8xf32> -> vector<8x8xf32>
    %cst_35 = arith.constant dense<0.000000e+00> : vector<8xf32>
    %76 = vector.multi_reduction <add>, %75, %cst_35 [0] : vector<8x8xf32> to vector<8xf32>
    %77 = vector.shape_cast %76 : vector<8xf32> to vector<1x8xf32>
    %cst_36 = arith.constant 8.000000e+00 : f32
    %78 = vector.broadcast %cst_36 : f32 to vector<1x8xf32>
    %79 = arith.divf %77, %78 : vector<1x8xf32>
    %80 = arith.mulf %75, %75 : vector<8x8xf32>
    %cst_37 = arith.constant dense<0.000000e+00> : vector<8xf32>
    %81 = vector.multi_reduction <add>, %80, %cst_37 [0] : vector<8x8xf32> to vector<8xf32>
    %82 = vector.shape_cast %81 : vector<8xf32> to vector<1x8xf32>
    %cst_38 = arith.constant 8.000000e+00 : f32
    %83 = vector.broadcast %cst_38 : f32 to vector<1x8xf32>
    %84 = arith.divf %82, %83 : vector<1x8xf32>
    %85 = arith.mulf %79, %79 : vector<1x8xf32>
    %86 = arith.subf %84, %85 : vector<1x8xf32>
    %cst_39 = arith.constant 0.000000e+00 : f32
    %87 = vector.broadcast %cst_39 : f32 to vector<1x8xf32>
    %88 = arith.maximumf %86, %87 : vector<1x8xf32>
    %cst_40 = arith.constant 9.99999974E-6 : f32
    %89 = vector.broadcast %cst_40 : f32 to vector<1x8xf32>
    %90 = arith.addf %88, %89 : vector<1x8xf32>
    %91 = math.rsqrt %90 : vector<1x8xf32>
    %92 = arith.mulf %73, %91 : vector<1x8xf32>
    %93 = arith.mulf %79, %92 : vector<1x8xf32>
    %94 = arith.subf %74, %93 : vector<1x8xf32>
    %95 = vector.broadcast %92 : vector<1x8xf32> to vector<8x8xf32>
    %96 = arith.mulf %75, %95 : vector<8x8xf32>
    %97 = vector.broadcast %94 : vector<1x8xf32> to vector<8x8xf32>
    %98 = arith.addf %96, %97 : vector<8x8xf32>
    %cst_41 = arith.constant 2.000000e+01 : f32
    %99 = vector.broadcast %cst_41 : f32 to vector<8x8xf32>
    %100 = arith.cmpf ogt, %98, %99 : vector<8x8xf32>
    %cst_42 = arith.constant 2.000000e+01 : f32
    %101 = vector.broadcast %cst_42 : f32 to vector<8x8xf32>
    %102 = arith.minimumf %98, %101 : vector<8x8xf32>
    %103 = math.exp %102 : vector<8x8xf32>
    %104 = math.log1p %103 : vector<8x8xf32>
    %105 = arith.select %100, %98, %104 : vector<8x8xi1>, vector<8x8xf32>
    %c3_43 = arith.constant 3 : index
    %c0_44 = arith.constant 0 : index
    %c0_45 = arith.constant 0 : index
    %106 = vector.load %arg1[%c3_43, %c0_44, %c0_45] : memref<4x32x24xf32, #tpu.memory_space<vmem>>, vector<1x8x5xf32>
    %107 = vector.shape_cast %106 : vector<1x8x5xf32> to vector<8x5xf32>
    %c6 = arith.constant 6 : index
    %c0_46 = arith.constant 0 : index
    %108 = vector.load %arg2[%c6, %c0_46] : memref<7x24xf32, #tpu.memory_space<vmem>>, vector<1x5xf32>
    %cst_47 = arith.constant dense<0.000000e+00> : vector<8x5xf32>
    %109 = tpu.matmul %105, %107, %cst_47 {dimension_numbers = #tpu.dot_dimension_numbers<[1], [0], [0], [1], [0, 0, 1, 1], [], []>} : vector<8x8xf32>, vector<8x5xf32>, vector<8x5xf32> -> vector<8x5xf32>
    %110 = vector.broadcast %108 : vector<1x5xf32> to vector<8x5xf32>
    %111 = arith.addf %109, %110 : vector<8x5xf32>
    %112 = tpu.iota {dimensions = array<i32: 1>} : vector<8x5xi32>
    %c2_i32 = arith.constant 2 : i32
    %113 = vector.broadcast %c2_i32 : i32 to vector<8x5xi32>
    %114 = arith.cmpi sge, %112, %113 : vector<8x5xi32>
    %c4_i32 = arith.constant 4 : i32
    %115 = vector.broadcast %c4_i32 : i32 to vector<8x5xi32>
    %116 = arith.cmpi slt, %112, %115 : vector<8x5xi32>
    %117 = arith.andi %114, %116 : vector<8x5xi1>
    %cst_48 = arith.constant 2.000000e+01 : f32
    %118 = vector.broadcast %cst_48 : f32 to vector<8x5xf32>
    %119 = arith.cmpf ogt, %111, %118 : vector<8x5xf32>
    %cst_49 = arith.constant 2.000000e+01 : f32
    %120 = vector.broadcast %cst_49 : f32 to vector<8x5xf32>
    %121 = arith.minimumf %111, %120 : vector<8x5xf32>
    %122 = math.exp %121 : vector<8x5xf32>
    %123 = math.log1p %122 : vector<8x5xf32>
    %124 = arith.select %119, %111, %123 : vector<8x5xi1>, vector<8x5xf32>
    %125 = arith.select %117, %124, %111 : vector<8x5xi1>, vector<8x5xf32>
    %c0_50 = arith.constant 0 : index
    %c0_51 = arith.constant 0 : index
    %126 = vector.load %arg3[%c0_50, %c0_51] : memref<8x5xf32, #tpu.memory_space<vmem>>, vector<8x5xf32>
    tpu.vector_store %arg3[%c0_50, %c0_51], %125 {strides = array<i32>} : memref<8x5xf32, #tpu.memory_space<vmem>>, vector<8x5xf32>,
    return
  }
}

</mosaic_0001>

<bundles_post_ra>
// kernel: tpu_custom_call.1
= control target key start
LH: loop header
LB: loop body
LE: loop exit
PB: predicated region body
PF: predicated region fallthrough
CT: control target
= control target key end

     0   :  { %s493_s0 = inlined_call_operand.vmem [shape: f32[8,32], index: 0, kind: input, shape index: {}]   ;;  %s494_s1 = inlined_call_operand.vmem [shape: f32[4,32,24], index: 1, kind: input, shape index: {}]   ;;  %s495_s2 = inlined_call_operand.vmem [shape: f32[7,24], index: 2, kind: input, shape index: {}]   ;;  %s496_s3 = inlined_call_operand.hbm [shape: f32[8,5], index: 3, kind: output, shape index: {}]  }
   0x1   :  { %v19_v0 = vld [vmem:[%s494_s1 + $0x18] sm:$0xff]  ;;  %v18_v1 = vld [vmem:[%s494_s1 + $0x10] sm:$0xff]  ;;  %v17_v2 = vld [vmem:[%s494_s1 + $0x8] sm:$0xff] }
   0x2   :  { %38 = vmatpush.msra.mxu0 %v19_v0 }
   0x3   :  { %8 = vsyncpa [#allocation3], 0  ;;  %v16_v3 = vld [vmem:[%s494_s1] sm:$0xff]  ;;  %vm22_vm0 = vcmask 261120   ;;  %v397_v5 = vmov 8.0   ;;  %vm46_vm1 = vcmask 195584  }
   0x4   :  { %39 = vmatpush.msra.mxu0 %v18_v1  ;;  %v15_v4 = vld [vmem:[%s493_s0] sm:$0xff]  ;;  %347 = vrcp.f32 %v397_v5  ;;  %v337_v34 = vld [vmem:[%s494_s1 + $0x30] sm:$0xff]  ;;  %v336_v35 = vld [vmem:[%s494_s1 + $0x28] sm:$0xff]  ;;  %vm135_vm8 = vcmask 130048   ;;  %vm216_vm14 = vcmask 64512   ;;  %s398_s19 = smov [#allocation2]  }
   0x5   :  { %128 = vmatpush.msra.mxu1 %v337_v34  ;;  %v335_v36 = vld [vmem:[%s494_s1 + $0x20] sm:$0xff]  ;;  %s325_s0 = sshll.u32 %s496_s3, 4  ;;  %s326_s0 = int_to_ptr.hbm [resolvable:$true] %s325_s0 }
   0x6   :  { %40 = vmatpush.msra.mxu0 %v17_v2  ;;  %v20_v42 = vld [vmem:[%s495_s2] sm:$0x1]  ;;  %v21_v46 = vld [vmem:[%s495_s2 + $0x1] sm:$0x1] }
   0x7   :  { %129 = vmatpush.msra.mxu1 %v336_v35  ;;  %v111_v35 = vld [vmem:[%s495_s2 + $0x3] sm:$0x1] }
   0x8   :  { %41 = vmatpush.msra.mxu0 %v16_v3 }
   0x9   :  { %334 = vmatmul.msk.f32.vlgmr.msra.gmra.mxu0 %vm22_vm0, %v15_v4  ;;  %130 = vmatpush.msra.mxu1 %v335_v36 }
   0xa   :  { %v348_v6 = vpop.eup %347 }
   0xb   :  { %v55_v7 = vmul.f32 8.0, %v348_v6  ;;  %vm59_vm2 = vweird.f32 %v348_v6 }
   0xd   :  { %v56_v8 = vsub.f32 1.0, %v55_v7 }
   0xf   :  { %v57_v13 = vmul.f32 %v348_v6, %v56_v8 }
  0x11   :  { %v58_v19 = vadd.f32 %v348_v6, %v57_v13 }
  0x13   :  { %v436_v24 = vsel %vm59_vm2, %v348_v6, %v58_v19 }
  0x86   :  { %v43_v9 = vpop.f32.mrf.mxu0 }
  0x87   :  { %v47_v10 = vsel %vm46_vm1, %v43_v9, 0.0  ;;  %v62_v11 = vmul.f32 %v43_v9, %v43_v9 }
  0x88   :  { %v48_v12 = vrot.slane %v47_v10, 4 }
  0x89   :  { %v63_v14 = vsel %vm46_vm1, %v62_v11, 0.0 }
  0x8a   :  { %v49_v15 = vadd.f32 %v48_v12, %v47_v10  ;;  %v64_v16 = vrot.slane %v63_v14, 4 }
  0x8c   :  { %v50_v17 = vrot.slane %v49_v15, 2  ;;  %v65_v18 = vadd.f32 %v64_v16, %v63_v14 }
  0x8e   :  { %v51_v20 = vadd.f32 %v50_v17, %v49_v15  ;;  %v66_v21 = vrot.slane %v65_v18, 2 }
  0x90   :  { %v52_v22 = vrot.slane %v51_v20, 1  ;;  %v67_v23 = vadd.f32 %v66_v21, %v65_v18 }
  0x92   :  { %v53_v25 = vadd.f32 %v52_v22, %v51_v20  ;;  %v68_v26 = vrot.slane %v67_v23, 1 }
  0x94   :  { %v61_v27 = vmul.f32 %v436_v24, %v53_v25  ;;  %v69_v28 = vadd.f32 %v68_v26, %v67_v23  ;;  %v340_v23 = vld [vmem:[%s494_s1 + $0x48] sm:$0xff]  ;;  %v339_v25 = vld [vmem:[%s494_s1 + $0x40] sm:$0xff] }
  0x95   :  { %210 = vmatpush.msra.mxu2 %v340_v23 }
  0x96   :  { %v70_v29 = vmul.f32 %v69_v28, %v436_v24  ;;  %v71_v30 = vmul.f32 %v61_v27, %v61_v27 }
  0x97   :  { %211 = vmatpush.msra.mxu2 %v339_v25 }
  0x98   :  { %v72_v31 = vsub.f32 %v70_v29, %v71_v30 }
  0x9a   :  { %v73_v32 = vmax.f32 %v72_v31, 0.0  ;;  %v110_v31 = vld [vmem:[%s495_s2 + $0x2] sm:$0x1] }
  0x9c   :  { %v74_v33 = vadd.f32 1e-05, %v73_v32 }
  0x9e   :  { %349 = vrsqrt.f32 %v74_v33  ;;  %vm81_vm4 = vweird.f32 %v74_v33 }
  0xa4   :  { %v350_v37 = vpop.eup %349 }
  0xa5   :  { %v76_v38 = vmul.f32 %v350_v37, %v74_v33  ;;  %vm82_vm3 = vweird.f32 %v350_v37 }
  0xa6   :  { %vm83_vm5 = vmor %vm81_vm4, %vm82_vm3 }
  0xa7   :  { %v77_v39 = vmul.f32 %v350_v37, %v76_v38 }
  0xa9   :  { %v78_v40 = vmul.f32 0.5, %v77_v39 }
  0xab   :  { %v79_v41 = vsub.f32 1.5, %v78_v40 }
  0xad   :  { %v80_v43 = vmul.f32 %v350_v37, %v79_v41 }
  0xaf   :  { %v84_v44 = vsel %vm83_vm5, %v350_v37, %v80_v43 }
  0xb0   :  { %v85_v45 = vmul.f32 %v84_v44, %v20_v42 }
  0xb2   :  { %v86_v47 = vmul.f32 %v85_v45, %v61_v27  ;;  %v88_v48 = vperm.slane %v85_v45, 0 }
  0xb4   :  { %v87_v49 = vsub.f32 %v21_v46, %v86_v47  ;;  %v89_v50 = vmul.f32 %v88_v48, %v43_v9 }
  0xb6   :  { %v90_v51 = vperm.slane %v87_v49, 0 }
  0xb8   :  { %v91_v52 = vadd.f32 %v90_v51, %v89_v50 }
  0xba   :  { %v93_v53 = vmin.f32 %v91_v52, 20.0  ;;  %vm92_vm7 = vcmp.gt.f32.partialorder %v91_v52, 20.0 }
  0xbc   :  { %v94_v54 = vmul.f32 1.442695, %v93_v53 }
  0xbe   :  { %351 = vpow2.f32 %v94_v54 }
  0xc4   :  { %v352_v55 = vpop.eup %351 }
  0xc5   :  { %v96_v56 = vadd.f32 1.0, %v352_v55  ;;  %v99_v57 = vmul.f32 -0.5, %v352_v55  ;;  %v102_v59 = vand.u32 2147483647, %v352_v55 }
  0xc7   :  { %353 = vlog2.f32 %v96_v56  ;;  %v100_v58 = vadd.f32 1.0, %v99_v57  ;;  %vm103_vm6 = vcmp.lt.f32.partialorder %v102_v59, 0.0004427343 }
  0xc9   :  { %v101_v62 = vmul.f32 %v352_v55, %v100_v58 }
  0xcd   :  { %v354_v60 = vpop.eup %353 }
  0xce   :  { %v98_v61 = vmul.f32 0.6931472, %v354_v60 }
  0xd0   :  { %v104_v63 = vsel %vm103_vm6, %v101_v62, %v98_v61 }
  0xd1   :  { %v105_v0 = vsel %vm92_vm7, %v91_v52, %v104_v63 }
  0xd2   :  { %338 = vmatmul.msk.f32.vlgmr.msra.gmra.mxu1 %vm46_vm1, %v105_v0 }
 0x14f   :  { %v132_v1 = vpop.f32.mrf.mxu1 }
 0x150   :  { %v136_v2 = vsel %vm135_vm8, %v132_v1, 0.0  ;;  %v144_v3 = vmul.f32 %v132_v1, %v132_v1 }
 0x151   :  { %v137_v4 = vrot.slane %v136_v2, 4 }
 0x152   :  { %v145_v5 = vsel %vm135_vm8, %v144_v3, 0.0 }
 0x153   :  { %v138_v6 = vadd.f32 %v137_v4, %v136_v2  ;;  %v146_v7 = vrot.slane %v145_v5, 4 }
 0x155   :  { %v139_v8 = vrot.slane %v138_v6, 2  ;;  %v147_v9 = vadd.f32 %v146_v7, %v145_v5 }
 0x157   :  { %v140_v10 = vadd.f32 %v139_v8, %v138_v6  ;;  %v148_v11 = vrot.slane %v147_v9, 2 }
 0x159   :  { %v141_v12 = vrot.slane %v140_v10, 1  ;;  %v149_v13 = vadd.f32 %v148_v11, %v147_v9 }
 0x15b   :  { %v142_v14 = vadd.f32 %v141_v12, %v140_v10  ;;  %v150_v15 = vrot.slane %v149_v13, 1  ;;  %v342_v12 = vld [vmem:[%s494_s1 + $0x60] sm:$0xff] }
 0x15c   :  { %291 = vmatpush.msra.mxu3 %v342_v12 }
 0x15d   :  { %v143_v16 = vmul.f32 %v142_v14, %v436_v24  ;;  %v151_v17 = vadd.f32 %v150_v15, %v149_v13 }
 0x15f   :  { %v152_v18 = vmul.f32 %v151_v17, %v436_v24  ;;  %v153_v19 = vmul.f32 %v143_v16, %v143_v16 }
 0x161   :  { %v154_v20 = vsub.f32 %v152_v18, %v153_v19 }
 0x163   :  { %v155_v21 = vmax.f32 %v154_v20, 0.0 }
 0x165   :  { %v156_v22 = vadd.f32 1e-05, %v155_v21  ;;  %v192_v21 = vld [vmem:[%s495_s2 + $0x5] sm:$0x1] }
 0x167   :  { %355 = vrsqrt.f32 %v156_v22  ;;  %vm163_vm10 = vweird.f32 %v156_v22 }
 0x16d   :  { %v356_v26 = vpop.eup %355 }
 0x16e   :  { %v158_v27 = vmul.f32 %v356_v26, %v156_v22  ;;  %vm164_vm9 = vweird.f32 %v356_v26 }
 0x16f   :  { %vm165_vm11 = vmor %vm163_vm10, %vm164_vm9  ;;  %vm316_vm9 = vcmask 39936  }
 0x170   :  { %v159_v28 = vmul.f32 %v356_v26, %v158_v27 }
 0x172   :  { %v160_v29 = vmul.f32 0.5, %v159_v28 }
 0x174   :  { %v161_v30 = vsub.f32 1.5, %v160_v29 }
 0x176   :  { %v162_v32 = vmul.f32 %v356_v26, %v161_v30 }
 0x178   :  { %v166_v33 = vsel %vm165_vm11, %v356_v26, %v162_v32 }
 0x179   :  { %v167_v34 = vmul.f32 %v166_v33, %v110_v31 }
 0x17b   :  { %v168_v36 = vmul.f32 %v167_v34, %v143_v16  ;;  %v170_v37 = vperm.slane %v167_v34, 0 }
 0x17d   :  { %v169_v38 = vsub.f32 %v111_v35, %v168_v36  ;;  %v171_v39 = vmul.f32 %v170_v37, %v132_v1 }
 0x17f   :  { %v172_v40 = vperm.slane %v169_v38, 0 }
 0x181   :  { %v173_v41 = vadd.f32 %v172_v40, %v171_v39 }
 0x183   :  { %v175_v42 = vmin.f32 %v173_v41, 20.0  ;;  %vm174_vm13 = vcmp.gt.f32.partialorder %v173_v41, 20.0 }
 0x185   :  { %v176_v43 = vmul.f32 1.442695, %v175_v42 }
 0x187   :  { %357 = vpow2.f32 %v176_v43 }
 0x18d   :  { %v358_v44 = vpop.eup %357 }
 0x18e   :  { %v178_v45 = vadd.f32 1.0, %v358_v44  ;;  %v181_v46 = vmul.f32 -0.5, %v358_v44  ;;  %v184_v48 = vand.u32 2147483647, %v358_v44 }
 0x190   :  { %359 = vlog2.f32 %v178_v45  ;;  %v182_v47 = vadd.f32 1.0, %v181_v46  ;;  %vm185_vm12 = vcmp.lt.f32.partialorder %v184_v48, 0.0004427343 }
 0x192   :  { %v183_v51 = vmul.f32 %v358_v44, %v182_v47  ;;  %v296_v47 = vlaneseq }
 0x196   :  { %v360_v49 = vpop.eup %359 }
 0x197   :  { %v180_v50 = vmul.f32 0.6931472, %v360_v49 }
 0x199   :  { %v186_v52 = vsel %vm185_vm12, %v183_v51, %v180_v50  ;;  %v297_v50 = vand.u32 127, %v296_v47 }
 0x19a   :  { %v187_v53 = vsel %vm174_vm13, %v173_v41, %v186_v52  ;;  %v346_v41 = vld [vmem:[%s495_s2 + $0x6] ss:$0 sm:$0xff] }
 0x19b   :  { %341 = vmatmul.msk.f32.vlgmr.msra.gmra.mxu2 %vm135_vm8, %v187_v53  ;;  %vm298_vm4 = vcmp.ge.s32.totalorder %v297_v50, 2  ;;  %vm299_vm5 = vcmp.lt.s32.totalorder %v297_v50, 4 }
 0x19c   :  { %vm300_vm6 = vmand %vm298_vm4, %vm299_vm5 }
 0x21e   :  { %v213_v54 = vpop.f32.mrf.mxu2 }
 0x21f   :  { %v217_v55 = vsel %vm216_vm14, %v213_v54, 0.0  ;;  %v225_v56 = vmul.f32 %v213_v54, %v213_v54 }
 0x220   :  { %v218_v57 = vrot.slane %v217_v55, 4 }
 0x221   :  { %v226_v58 = vsel %vm216_vm14, %v225_v56, 0.0 }
 0x222   :  { %v219_v59 = vadd.f32 %v218_v57, %v217_v55  ;;  %v227_v60 = vrot.slane %v226_v58, 4 }
 0x224   :  { %v220_v61 = vrot.slane %v219_v59, 2  ;;  %v228_v62 = vadd.f32 %v227_v60, %v226_v58 }
 0x226   :  { %v221_v63 = vadd.f32 %v220_v61, %v219_v59  ;;  %v229_v0 = vrot.slane %v228_v62, 2 }
 0x228   :  { %v222_v1 = vrot.slane %v221_v63, 1  ;;  %v230_v2 = vadd.f32 %v229_v0, %v228_v62 }
 0x22a   :  { %v223_v3 = vadd.f32 %v222_v1, %v221_v63  ;;  %v231_v4 = vrot.slane %v230_v2, 1 }
 0x22c   :  { %v224_v5 = vmul.f32 %v223_v3, %v436_v24  ;;  %v232_v6 = vadd.f32 %v231_v4, %v230_v2 }
 0x22e   :  { %v233_v7 = vmul.f32 %v232_v6, %v436_v24  ;;  %v234_v8 = vmul.f32 %v224_v5, %v224_v5  ;;  %v191_v24 = vld [vmem:[%s495_s2 + $0x4] sm:$0x1]  ;;  %s323_s2 = sshll.u32 %s398_s19, 4  ;;  %s324_s2 = int_to_ptr.vmem [resolvable:$true] %s323_s2 }
 0x230   :  { %v235_v9 = vsub.f32 %v233_v7, %v234_v8 }
 0x232   :  { %v236_v10 = vmax.f32 %v235_v9, 0.0 }
 0x234   :  { %v237_v11 = vadd.f32 1e-05, %v236_v10 }
 0x236   :  { %361 = vrsqrt.f32 %v237_v11  ;;  %vm244_vm0 = vweird.f32 %v237_v11 }
 0x23c   :  { %v362_v13 = vpop.eup %361 }
 0x23d   :  { %v239_v14 = vmul.f32 %v362_v13, %v237_v11  ;;  %vm245_vm15 = vweird.f32 %v362_v13 }
 0x23e   :  { %vm246_vm1 = vmor %vm244_vm0, %vm245_vm15 }
 0x23f   :  { %v240_v15 = vmul.f32 %v362_v13, %v239_v14 }
 0x241   :  { %v241_v16 = vmul.f32 0.5, %v240_v15 }
 0x243   :  { %v242_v17 = vsub.f32 1.5, %v241_v16 }
 0x245   :  { %v243_v18 = vmul.f32 %v362_v13, %v242_v17 }
 0x247   :  { %v247_v19 = vsel %vm246_vm1, %v362_v13, %v243_v18 }
 0x248   :  { %v248_v20 = vmul.f32 %v247_v19, %v191_v24 }
 0x24a   :  { %v249_v22 = vmul.f32 %v248_v20, %v224_v5  ;;  %v251_v23 = vperm.slane %v248_v20, 0 }
 0x24c   :  { %v250_v25 = vsub.f32 %v192_v21, %v249_v22  ;;  %v252_v26 = vmul.f32 %v251_v23, %v213_v54 }
 0x24e   :  { %v253_v27 = vperm.slane %v250_v25, 0 }
 0x250   :  { %v254_v28 = vadd.f32 %v253_v27, %v252_v26 }
 0x252   :  { %v256_v29 = vmin.f32 %v254_v28, 20.0  ;;  %vm255_vm3 = vcmp.gt.f32.partialorder %v254_v28, 20.0 }
 0x254   :  { %v257_v30 = vmul.f32 1.442695, %v256_v29 }
 0x256   :  { %363 = vpow2.f32 %v257_v30 }
 0x25c   :  { %v364_v31 = vpop.eup %363 }
 0x25d   :  { %v259_v32 = vadd.f32 1.0, %v364_v31  ;;  %v262_v33 = vmul.f32 -0.5, %v364_v31  ;;  %v265_v35 = vand.u32 2147483647, %v364_v31 }
 0x25f   :  { %365 = vlog2.f32 %v259_v32  ;;  %v263_v34 = vadd.f32 1.0, %v262_v33  ;;  %vm266_vm2 = vcmp.lt.f32.partialorder %v265_v35, 0.0004427343 }
 0x261   :  { %v264_v38 = vmul.f32 %v364_v31, %v263_v34 }
 0x265   :  { %v366_v36 = vpop.eup %365 }
 0x266   :  { %v261_v37 = vmul.f32 0.6931472, %v366_v36 }
 0x268   :  { %v267_v39 = vsel %vm266_vm2, %v264_v38, %v261_v37 }
 0x269   :  { %v268_v40 = vsel %vm255_vm3, %v254_v28, %v267_v39 }
 0x26a   :  { %343 = vmatmul.msk.f32.vlgmr.msra.gmra.mxu3 %vm216_vm14, %v268_v40 }
 0x2ed   :  { %v293_v42 = vpop.f32.mrf.mxu3 }
 0x2ee   :  { %v294_v43 = vadd.f32 %v346_v41, %v293_v42 }
 0x2f0   :  { %v302_v44 = vmin.f32 %v294_v43, 20.0  ;;  %vm301_vm8 = vcmp.gt.f32.partialorder %v294_v43, 20.0 }
 0x2f2   :  { %v303_v45 = vmul.f32 1.442695, %v302_v44 }
 0x2f4   :  { %367 = vpow2.f32 %v303_v45 }
 0x2fa   :  { %v368_v46 = vpop.eup %367 }
 0x2fb   :  { %v305_v48 = vadd.f32 1.0, %v368_v46  ;;  %v308_v49 = vmul.f32 -0.5, %v368_v46  ;;  %v311_v52 = vand.u32 2147483647, %v368_v46 }
 0x2fd   :  { %369 = vlog2.f32 %v305_v48  ;;  %v309_v51 = vadd.f32 1.0, %v308_v49  ;;  %vm312_vm7 = vcmp.lt.f32.partialorder %v311_v52, 0.0004427343 }
 0x2ff   :  { %v310_v55 = vmul.f32 %v368_v46, %v309_v51 }
 0x303   :  { %v370_v53 = vpop.eup %369 }
 0x304   :  { %v307_v54 = vmul.f32 0.6931472, %v370_v53 }
 0x306   :  { %v313_v56 = vsel %vm312_vm7, %v310_v55, %v307_v54 }
 0x307   :  { %v314_v57 = vsel %vm301_vm8, %v294_v43, %v313_v56 }
 0x308   :  { %v315_v58 = vsel %vm300_vm6, %v314_v57, %v294_v43 }
 0x309   :  { %317 = vst.msk [vmem:[#allocation2] sm:$0xff] %vm316_vm9, %v315_v58 }
 0x30a   :  { %328 = dma.vmem_to_hbm [thread:$0]  %s324_s2, 128, %s326_s0, [#allocation3]  }
 0x30b   :  { %395 = dma.done.wait [#allocation3], 128  }
 0x30c   :  { %396 = vsyncadd [#allocation3], 4294967168 }
 0x30d   :  { %333 = vsyncpa [#allocation3], 1 }

</bundles_post_ra>
